<compile_context>
chip_gen: v7x
topology: tpu7x:2x2x1
jax: 0.10.0
libtpu: 0.0.40
codegen_flags: <defaults>
</compile_context>

<pallas_src>
import jax
import jax.numpy as jnp
from jax.experimental import pallas as pl
from jax.experimental.pallas import tpu as pltpu

HIDDEN = 32  # GConvLSTM(node_features, 32, 1)


def gconv_lstm_seq_kernel(x_ref, h0_ref, c0_ref, wx_ref, ws_ref, bias_ref,
                          wco_ref, wlin_ref, blin_ref,
                          out_ref, hc_ref, c_sc, hc1_sc):
    H = HIDDEN
    t = pl.program_id(1)
    last_t = pl.num_programs(1) - 1

    @pl.when(t == 0)
    def _():
        # Reset carried state for this node block and zero the out accumulator.
        c_sc[...] = c0_ref[...]
        hc1_sc[...] = jnp.concatenate(
            [h0_ref[...], c0_ref[...]], axis=-1).astype(jnp.bfloat16)
        out_ref[...] = jnp.zeros_like(out_ref)

    # Two MXU pushes (bf16 operands, f32 accumulation):
    #   x_t @ Wx                         [block_n, F_pad] @ [F_pad, 4H]
    #   [h | c] @ [Wh ; peephole-diag]   [block_n, 2H]    @ [2H,   4H]
    # plus a single f32 bias add on the VPU.
    pre = (jnp.dot(x_ref[0], wx_ref[...], preferred_element_type=jnp.float32)
           + jnp.dot(hc1_sc[...], ws_ref[...],
                     preferred_element_type=jnp.float32)
           + bias_ref[...])                                  # [block_n, 4H] f32

    # Full 128-lane transcendentals; slice each 32-lane gate once afterwards.
    sig = jax.nn.sigmoid(pre)       # i/f gates already include peephole + bias
    tnh = jnp.tanh(pre)             # c-candidate slot (no peephole)
    i_gate = sig[:, 0 * H:1 * H]
    f_gate = sig[:, 1 * H:2 * H]
    t_cell = tnh[:, 2 * H:3 * H]

    c = c_sc[...]                                            # f32 carried state
    c_new = f_gate * c + i_gate * t_cell
    # Output-gate peephole uses C_new, so it is applied on its 32-lane slice.
    o_gate = jax.nn.sigmoid(pre[:, 3 * H:4 * H] + wco_ref[...] * c_new)
    h_new = o_gate * jnp.tanh(c_new)

    # Carry state: f32 c for the recurrence, bf16 [h|c] slab for next matmul.
    c_sc[...] = c_new
    hc1_sc[...] = jnp.concatenate([h_new, c_new], axis=-1).astype(jnp.bfloat16)

    # Outer module: Linear(32, 1)(relu(h_new)) as VPU mul + lane reduction.
    out_t = (jnp.sum(jnp.maximum(h_new, 0.0) * wlin_ref[...], axis=-1,
                     keepdims=True) + blin_ref[...])         # [block_n, 1]

    # Lane-dense accumulate into the resident [block_n, T_pad] output block
    # (one-hot column select); HBM writeback happens once, full-width.
    t_pad = out_ref.shape[1]
    onehot = (jax.lax.broadcasted_iota(jnp.int32, (1, t_pad), 1)
              == t).astype(jnp.float32)
    out_ref[...] += out_t * onehot

    @pl.when(t == last_t)
    def _():
        hc_ref[...] = jnp.concatenate([h_new, c_new], axis=-1)  # [block_n, 2H]


def _choose_block_n(n):
    # Node tile: multiple of 16 (bf16 sublane packing), as large as comfortably
    # fits scoped VMEM, and >=2 blocks when N permits so the "parallel" node
    # axis shards across TensorCores (v7x has 2 TCs).
    if n > 1024:
        return 512  # TODO(synk): roughly halve on v7x (64 MiB VMEM) at huge N.
    if n >= 32 and n % 32 == 0:
        return n // 2
    return n


def gconv_lstm_sequence(xs, h0, c0, params):
    """Run the GConvLSTM cell + Linear head over T timesteps in one kernel.

    xs: [T, N, F_in]; h0, c0: [N, HIDDEN].
    Returns (outs [T, N, 1], h_T [N, HIDDEN], c_T [N, HIDDEN]).
    """
    T, n, f_in = xs.shape
    H = HIDDEN
    f_pad = params["wx"].shape[0]
    t_pad = 128 * pl.cdiv(T, 128)              # lane-dense output slab
    block_n = _choose_block_n(n)
    n_pad = block_n * pl.cdiv(n, block_n)

    xs_p = jnp.zeros((T, n_pad, f_pad), jnp.bfloat16)
    xs_p = xs_p.at[:, :n, :f_in].set(xs.astype(jnp.bfloat16))
    h_p = jnp.zeros((n_pad, H), jnp.float32).at[:n].set(h0.astype(jnp.float32))
    c_p = jnp.zeros((n_pad, H), jnp.float32).at[:n].set(c0.astype(jnp.float32))

    grid = (n_pad // block_n, T)

    def rep(shape):  # resident blocks: same block every grid step (no re-DMA)
        return pl.BlockSpec(shape, lambda nb, t: (0, 0))

    out_seq, hc = pl.pallas_call(
        gconv_lstm_seq_kernel,
        out_shape=(jax.ShapeDtypeStruct((n_pad, t_pad), jnp.float32),
                   jax.ShapeDtypeStruct((n_pad, 2 * H), jnp.float32)),
        grid_spec=pltpu.PrefetchScalarGridSpec(
            num_scalar_prefetch=0,
            grid=grid,
            in_specs=[
                pl.BlockSpec((1, block_n, f_pad), lambda nb, t: (t, nb, 0)),
                pl.BlockSpec((block_n, H), lambda nb, t: (nb, 0)),   # h0
                pl.BlockSpec((block_n, H), lambda nb, t: (nb, 0)),   # c0
                rep((f_pad, 4 * H)),        # Wx (bf16, K padded to mult of 16)
                rep((2 * H, 4 * H)),        # [Wh ; diag(wc_i)|diag(wc_f)|0|0]
                rep((1, 4 * H)),            # fused gate bias (f32)
                rep((1, H)),                # w_c_o (f32)
                rep((1, H)),                # Linear weight row (f32)
                rep((1, 1)),                # Linear bias
            ],
            out_specs=(pl.BlockSpec((block_n, t_pad), lambda nb, t: (nb, 0)),
                       pl.BlockSpec((block_n, 2 * H), lambda nb, t: (nb, 0))),
            scratch_shapes=[
                pltpu.VMEM((block_n, H), jnp.float32),        # carried c (f32)
                pltpu.VMEM((block_n, 2 * H), jnp.bfloat16),   # [h|c] matmul slab
            ]),
        compiler_params=pltpu.CompilerParams(
            dimension_semantics=("parallel", "arbitrary")),
    )(xs_p, h_p, c_p, params["wx"], params["ws"], params["bias"],
      params["wc_o"], params["wlin"], params["blin"])

    outs = jnp.transpose(out_seq[:n, :T])[:, :, None]       # [T, N, 1]
    return outs, hc[:n, :H], hc[:n, H:]


def recurrent_gcn_gconvlstm(x, edge_index, edge_weight, h, c, params):
    """Exact module forward: one GConvLSTM step + relu + Linear(32, 1)."""
    # edge_index / edge_weight accepted for interface fidelity but unused:
    # ChebConv with K=1 has no graph-propagation term.
    del edge_index, edge_weight
    outs, h_new, c_new = gconv_lstm_sequence(x[None], h, c, params)
    return outs[0], h_new, c_new


def init_params(key, f_in):
    """Deterministic synthetic parameters (shapes match the torch module)."""
    H = HIDDEN
    f_pad = 16 * pl.cdiv(f_in, 16)
    ks = jax.random.split(key, 10)

    def rnd(k, shape, scale=0.1):
        return scale * jax.random.normal(k, shape, jnp.float32)

    # Gate order along the stacked feature axis: (i, f, c, o).
    wx = rnd(ks[0], (f_in, 4 * H))             # ChebConv(K=1) weights on X
    wh = rnd(ks[1], (H, 4 * H))                # ChebConv(K=1) weights on H
    bx = rnd(ks[2], (1, 4 * H))                # ChebConv bias (X branch)
    bh = rnd(ks[3], (1, 4 * H))                # ChebConv bias (H branch)
    bg = rnd(ks[4], (1, 4 * H))                # gate biases b_i, b_f, b_c, b_o
    bias = bx + bh + bg                        # additive biases fold together (f32)

    wc_i = rnd(ks[5], (H,))                    # peephole weights
    wc_f = rnd(ks[6], (H,))
    wc_o = rnd(ks[7], (1, H))

    # X-branch weights: zero-pad the K dim to a multiple of 16, bf16 for MXU.
    wx_p = jnp.zeros((f_pad, 4 * H), jnp.float32).at[:f_in].set(wx)
    # State-branch weights: rows 0:H = Wh, rows H:2H = block-diagonal i/f
    # peephole (c @ diag(wc) == wc * c elementwise); c/o gate columns zero.
    peep = jnp.concatenate(
        [jnp.diag(wc_i), jnp.diag(wc_f), jnp.zeros((H, 2 * H), jnp.float32)],
        axis=1)                                             # [H, 4H]
    ws = jnp.concatenate([wh, peep], axis=0)                # [2H, 4H]

    wlin = rnd(ks[8], (H, 1)).T                # torch.nn.Linear(32, 1) -> [1, H]
    blin = rnd(ks[9], (1, 1))
    return dict(wx=wx_p.astype(jnp.bfloat16), ws=ws.astype(jnp.bfloat16),
                bias=bias, wc_o=wc_o, wlin=wlin, blin=blin)


def _reference_step(x, h, c, params, f_in):
    """Pure-JAX reference for one cell step (uses the same rounded weights)."""
    H = HIDDEN
    wx = params["wx"].astype(jnp.float32)[:f_in]
    ws = params["ws"].astype(jnp.float32)
    wh = ws[:H]
    wc_i = jnp.diag(ws[H:2 * H, 0:H])
    wc_f = jnp.diag(ws[H:2 * H, H:2 * H])
    pre = x @ wx + h @ wh + params["bias"]
    i = jax.nn.sigmoid(pre[:, 0:H] + wc_i * c)
    f = jax.nn.sigmoid(pre[:, H:2 * H] + wc_f * c)
    tc = jnp.tanh(pre[:, 2 * H:3 * H])
    c_new = f * c + i * tc
    o = jax.nn.sigmoid(pre[:, 3 * H:4 * H] + params["wc_o"] * c_new)
    h_new = o * jnp.tanh(c_new)
    out = jnp.maximum(h_new, 0.0) @ params["wlin"].T + params["blin"]
    return out, h_new, c_new


if __name__ == "__main__":
    N, F_IN, T = 32, 4, 8   # 32 graph nodes, 4 node features, 8 timesteps
    key = jax.random.PRNGKey(0)
    ks = jax.random.split(key, 5)

    x = jax.random.normal(ks[0], (N, F_IN), jnp.float32)
    xs = jax.random.normal(ks[1], (T, N, F_IN), jnp.float32)
    h = jax.random.normal(ks[2], (N, HIDDEN), jnp.float32)
    c = jax.random.normal(ks[3], (N, HIDDEN), jnp.float32)

    # Simple ring graph (mathematically unused by the K=1 ChebConv; API only).
    src = jnp.arange(N, dtype=jnp.int32)
    dst = jnp.roll(src, -1)
    edge_index = jnp.stack([src, dst])
    edge_weight = jnp.ones((N,), jnp.float32)

    params = init_params(ks[4], F_IN)

    # ---- single-step forward (exact module signature / semantics) ----
    out, h0, c0 = recurrent_gcn_gconvlstm(x, edge_index, edge_weight, h, c,
                                          params)
    jax.block_until_ready((out, h0, c0))
    assert out.shape == (N, 1)
    assert h0.shape == (N, HIDDEN)
    assert c0.shape == (N, HIDDEN)

    ref_out, ref_h, ref_c = _reference_step(x, h, c, params, F_IN)
    err1 = max(float(jnp.max(jnp.abs(out - ref_out))),
               float(jnp.max(jnp.abs(h0 - ref_h))),
               float(jnp.max(jnp.abs(c0 - ref_c))))
    assert err1 < 5e-2, f"single-step mismatch: {err1}"

    # ---- fused multi-step run (time loop internal to one pallas_call) ----
    outs, h_t, c_t = gconv_lstm_sequence(xs, h, c, params)
    jax.block_until_ready((outs, h_t, c_t))
    assert outs.shape == (T, N, 1)
    assert h_t.shape == (N, HIDDEN) and c_t.shape == (N, HIDDEN)

    rh, rc = h, c
    ref_outs = []
    for ti in range(T):
        ro, rh, rc = _reference_step(xs[ti], rh, rc, params, F_IN)
        ref_outs.append(ro)
    ref_outs = jnp.stack(ref_outs)
    err2 = max(float(jnp.max(jnp.abs(outs - ref_outs))),
               float(jnp.max(jnp.abs(h_t - rh))),
               float(jnp.max(jnp.abs(c_t - rc))))
    assert err2 < 1e-1, f"sequence mismatch: {err2}"

    print("KERNEL_OK")
</pallas_src>

<mosaic_0001>
module attributes {stable_mosaic.version = 11 : i64} {
  func.func @gconv_lstm_seq_kernel(%arg0: i32, %arg1: i32, %arg2: memref<1x16x16xbf16, #tpu.memory_space<vmem>>, %arg3: memref<16x32xf32, #tpu.memory_space<vmem>>, %arg4: memref<16x32xf32, #tpu.memory_space<vmem>>, %arg5: memref<16x128xbf16, #tpu.memory_space<vmem>>, %arg6: memref<64x128xbf16, #tpu.memory_space<vmem>>, %arg7: memref<1x128xf32, #tpu.memory_space<vmem>>, %arg8: memref<1x32xf32, #tpu.memory_space<vmem>>, %arg9: memref<1x32xf32, #tpu.memory_space<vmem>>, %arg10: memref<1x1xf32, #tpu.memory_space<vmem>>, %arg11: memref<16x128xf32, #tpu.memory_space<vmem>>, %arg12: memref<16x64xf32, #tpu.memory_space<vmem>>, %arg13: memref<16x32xf32, #tpu.memory_space<vmem>>, %arg14: memref<16x64xbf16, #tpu.memory_space<vmem>>) attributes {dimension_semantics = [#tpu.dimension_semantics<parallel>, #tpu.dimension_semantics<arbitrary>], iteration_bounds = array<i64: 2, 1>, scalar_prefetch = 0 : i64, scratch_operands = 2 : i64, tpu.core_type = #tpu.core_type<tc>, window_params = [{transform_indices = @transform_0, window_bounds = array<i64: 1, 16, 16>}, {transform_indices = @transform_1, window_bounds = array<i64: 16, 32>}, {transform_indices = @transform_2, window_bounds = array<i64: 16, 32>}, {pipeline_mode = #tpu.pipeline_mode<synchronous>, transform_indices = @transform_3, window_bounds = array<i64: 16, 128>}, {pipeline_mode = #tpu.pipeline_mode<synchronous>, transform_indices = @transform_4, window_bounds = array<i64: 64, 128>}, {pipeline_mode = #tpu.pipeline_mode<synchronous>, transform_indices = @transform_5, window_bounds = array<i64: 1, 128>}, {pipeline_mode = #tpu.pipeline_mode<synchronous>, transform_indices = @transform_6, window_bounds = array<i64: 1, 32>}, {pipeline_mode = #tpu.pipeline_mode<synchronous>, transform_indices = @transform_7, window_bounds = array<i64: 1, 32>}, {pipeline_mode = #tpu.pipeline_mode<synchronous>, transform_indices = @transform_8, window_bounds = array<i64: 1, 1>}, {transform_indices = @transform_9, window_bounds = array<i64: 16, 128>}, {transform_indices = @transform_10, window_bounds = array<i64: 16, 64>}]} {
    %c0_i32 = arith.constant 0 : i32
    %0 = arith.cmpi eq, %arg1, %c0_i32 : i32
    %1 = arith.extui %0 : i1 to i32
    %c0_i32_0 = arith.constant 0 : i32
    %2 = arith.cmpi ne, %1, %c0_i32_0 : i32
    scf.if %2 {
      %c0_34 = arith.constant 0 : index
      %c0_35 = arith.constant 0 : index
      %67 = vector.load %arg4[%c0_34, %c0_35] : memref<16x32xf32, #tpu.memory_space<vmem>>, vector<16x32xf32>
      %c0_36 = arith.constant 0 : index
      %c0_37 = arith.constant 0 : index
      %68 = vector.load %arg13[%c0_36, %c0_37] : memref<16x32xf32, #tpu.memory_space<vmem>>, vector<16x32xf32>
      tpu.vector_store %arg13[%c0_36, %c0_37], %67 {strides = array<i32>} : memref<16x32xf32, #tpu.memory_space<vmem>>, vector<16x32xf32>,
      %c0_38 = arith.constant 0 : index
      %c0_39 = arith.constant 0 : index
      %69 = vector.load %arg3[%c0_38, %c0_39] : memref<16x32xf32, #tpu.memory_space<vmem>>, vector<16x32xf32>
      %c0_40 = arith.constant 0 : index
      %c0_41 = arith.constant 0 : index
      %70 = vector.load %arg4[%c0_40, %c0_41] : memref<16x32xf32, #tpu.memory_space<vmem>>, vector<16x32xf32>
      %71 = tpu.concatenate %69, %70 in 1 : vector<16x32xf32>, vector<16x32xf32> -> vector<16x64xf32>
      %72 = arith.truncf %71 : vector<16x64xf32> to vector<16x64xbf16>
      %c0_42 = arith.constant 0 : index
      %c0_43 = arith.constant 0 : index
      %73 = vector.load %arg14[%c0_42, %c0_43] : memref<16x64xbf16, #tpu.memory_space<vmem>>, vector<16x64xbf16>
      tpu.vector_store %arg14[%c0_42, %c0_43], %72 {strides = array<i32>} : memref<16x64xbf16, #tpu.memory_space<vmem>>, vector<16x64xbf16>,
      %cst_44 = arith.constant 0.000000e+00 : f32
      %74 = vector.broadcast %cst_44 : f32 to vector<16x128xf32>
      %c0_45 = arith.constant 0 : index
      %c0_46 = arith.constant 0 : index
      %75 = vector.load %arg11[%c0_45, %c0_46] : memref<16x128xf32, #tpu.memory_space<vmem>>, vector<16x128xf32>
      tpu.vector_store %arg11[%c0_45, %c0_46], %74 {strides = array<i32>} : memref<16x128xf32, #tpu.memory_space<vmem>>, vector<16x128xf32>,
    } else {
    }
    %c0 = arith.constant 0 : index
    %c0_1 = arith.constant 0 : index
    %c0_2 = arith.constant 0 : index
    %3 = vector.load %arg2[%c0, %c0_1, %c0_2] : memref<1x16x16xbf16, #tpu.memory_space<vmem>>, vector<1x16x16xbf16>
    %4 = vector.shape_cast %3 : vector<1x16x16xbf16> to vector<16x16xbf16>
    %c0_3 = arith.constant 0 : index
    %c0_4 = arith.constant 0 : index
    %5 = vector.load %arg5[%c0_3, %c0_4] : memref<16x128xbf16, #tpu.memory_space<vmem>>, vector<16x128xbf16>
    %cst = arith.constant dense<0.000000e+00> : vector<16x128xf32>
    %6 = tpu.matmul %4, %5, %cst {dimension_numbers = #tpu.dot_dimension_numbers<[1], [0], [0], [1], [0, 0, 1, 1], [], []>} : vector<16x16xbf16>, vector<16x128xbf16>, vector<16x128xf32> -> vector<16x128xf32>
    %c0_5 = arith.constant 0 : index
    %c0_6 = arith.constant 0 : index
    %7 = vector.load %arg14[%c0_5, %c0_6] : memref<16x64xbf16, #tpu.memory_space<vmem>>, vector<16x64xbf16>
    %c0_7 = arith.constant 0 : index
    %c0_8 = arith.constant 0 : index
    %8 = vector.load %arg6[%c0_7, %c0_8] : memref<64x128xbf16, #tpu.memory_space<vmem>>, vector<64x128xbf16>
    %cst_9 = arith.constant dense<0.000000e+00> : vector<16x128xf32>
    %9 = tpu.matmul %7, %8, %cst_9 {dimension_numbers = #tpu.dot_dimension_numbers<[1], [0], [0], [1], [0, 0, 1, 1], [], []>} : vector<16x64xbf16>, vector<64x128xbf16>, vector<16x128xf32> -> vector<16x128xf32>
    %10 = arith.addf %6, %9 : vector<16x128xf32>
    %c0_10 = arith.constant 0 : index
    %c0_11 = arith.constant 0 : index
    %11 = vector.load %arg7[%c0_10, %c0_11] : memref<1x128xf32, #tpu.memory_space<vmem>>, vector<1x128xf32>
    %12 = vector.broadcast %11 : vector<1x128xf32> to vector<16x128xf32>
    %13 = arith.addf %10, %12 : vector<16x128xf32>
    %14 = arith.negf %13 : vector<16x128xf32>
    %15 = math.exp %14 : vector<16x128xf32>
    %cst_12 = arith.constant 1.000000e+00 : f32
    %16 = vector.broadcast %cst_12 : f32 to vector<16x128xf32>
    %17 = arith.addf %16, %15 : vector<16x128xf32>
    %18 = arith.divf %16, %17 : vector<16x128xf32>
    %19 = math.tanh %13 : vector<16x128xf32>
    %20 = vector.extract_strided_slice %18 {offsets = [0, 0], sizes = [16, 32], strides = [1, 1]} : vector<16x128xf32> to vector<16x32xf32>
    %21 = vector.extract_strided_slice %18 {offsets = [0, 32], sizes = [16, 32], strides = [1, 1]} : vector<16x128xf32> to vector<16x32xf32>
    %22 = vector.extract_strided_slice %19 {offsets = [0, 64], sizes = [16, 32], strides = [1, 1]} : vector<16x128xf32> to vector<16x32xf32>
    %c0_13 = arith.constant 0 : index
    %c0_14 = arith.constant 0 : index
    %23 = vector.load %arg13[%c0_13, %c0_14] : memref<16x32xf32, #tpu.memory_space<vmem>>, vector<16x32xf32>
    %24 = arith.mulf %21, %23 : vector<16x32xf32>
    %25 = arith.mulf %20, %22 : vector<16x32xf32>
    %26 = arith.addf %24, %25 : vector<16x32xf32>
    %27 = vector.extract_strided_slice %13 {offsets = [0, 96], sizes = [16, 32], strides = [1, 1]} : vector<16x128xf32> to vector<16x32xf32>
    %c0_15 = arith.constant 0 : index
    %c0_16 = arith.constant 0 : index
    %28 = vector.load %arg8[%c0_15, %c0_16] : memref<1x32xf32, #tpu.memory_space<vmem>>, vector<1x32xf32>
    %29 = vector.broadcast %28 : vector<1x32xf32> to vector<16x32xf32>
    %30 = arith.mulf %29, %26 : vector<16x32xf32>
    %31 = arith.addf %27, %30 : vector<16x32xf32>
    %32 = arith.negf %31 : vector<16x32xf32>
    %33 = math.exp %32 : vector<16x32xf32>
    %cst_17 = arith.constant 1.000000e+00 : f32
    %34 = vector.broadcast %cst_17 : f32 to vector<16x32xf32>
    %35 = arith.addf %34, %33 : vector<16x32xf32>
    %36 = arith.divf %34, %35 : vector<16x32xf32>
    %37 = math.tanh %26 : vector<16x32xf32>
    %38 = arith.mulf %36, %37 : vector<16x32xf32>
    %c0_18 = arith.constant 0 : index
    %c0_19 = arith.constant 0 : index
    %39 = vector.load %arg13[%c0_18, %c0_19] : memref<16x32xf32, #tpu.memory_space<vmem>>, vector<16x32xf32>
    tpu.vector_store %arg13[%c0_18, %c0_19], %26 {strides = array<i32>} : memref<16x32xf32, #tpu.memory_space<vmem>>, vector<16x32xf32>,
    %40 = tpu.concatenate %38, %26 in 1 : vector<16x32xf32>, vector<16x32xf32> -> vector<16x64xf32>
    %41 = arith.truncf %40 : vector<16x64xf32> to vector<16x64xbf16>
    %c0_20 = arith.constant 0 : index
    %c0_21 = arith.constant 0 : index
    %42 = vector.load %arg14[%c0_20, %c0_21] : memref<16x64xbf16, #tpu.memory_space<vmem>>, vector<16x64xbf16>
    tpu.vector_store %arg14[%c0_20, %c0_21], %41 {strides = array<i32>} : memref<16x64xbf16, #tpu.memory_space<vmem>>, vector<16x64xbf16>,
    %cst_22 = arith.constant 0.000000e+00 : f32
    %43 = vector.broadcast %cst_22 : f32 to vector<16x32xf32>
    %44 = arith.maximumf %38, %43 : vector<16x32xf32>
    %c0_23 = arith.constant 0 : index
    %c0_24 = arith.constant 0 : index
    %45 = vector.load %arg9[%c0_23, %c0_24] : memref<1x32xf32, #tpu.memory_space<vmem>>, vector<1x32xf32>
    %46 = vector.broadcast %45 : vector<1x32xf32> to vector<16x32xf32>
    %47 = arith.mulf %44, %46 : vector<16x32xf32>
    %cst_25 = arith.constant dense<0.000000e+00> : vector<16xf32>
    %48 = vector.multi_reduction <add>, %47, %cst_25 [1] : vector<16x32xf32> to vector<16xf32>
    %49 = vector.shape_cast %48 : vector<16xf32> to vector<16x1xf32>
    %c0_26 = arith.constant 0 : index
    %c0_27 = arith.constant 0 : index
    %50 = vector.load %arg10[%c0_26, %c0_27] : memref<1x1xf32, #tpu.memory_space<vmem>>, vector<1x1xf32>
    %51 = vector.broadcast %50 : vector<1x1xf32> to vector<16x1xf32>
    %52 = arith.addf %49, %51 : vector<16x1xf32>
    %53 = tpu.iota {dimensions = array<i32: 1>} : vector<1x128xi32>
    %54 = vector.broadcast %arg1 : i32 to vector<1x128xi32>
    %55 = arith.cmpi eq, %53, %54 : vector<1x128xi32>
    %56 = arith.extui %55 : vector<1x128xi1> to vector<1x128xi32>
    %57 = arith.sitofp %56 : vector<1x128xi32> to vector<1x128xf32>
    %c0_28 = arith.constant 0 : index
    %c0_29 = arith.constant 0 : index
    %58 = vector.load %arg11[%c0_28, %c0_29] : memref<16x128xf32, #tpu.memory_space<vmem>>, vector<16x128xf32>
    %59 = vector.broadcast %52 : vector<16x1xf32> to vector<16x128xf32>
    %60 = vector.broadcast %57 : vector<1x128xf32> to vector<16x128xf32>
    %61 = arith.mulf %59, %60 : vector<16x128xf32>
    %62 = arith.addf %58, %61 : vector<16x128xf32>
    %c0_30 = arith.constant 0 : index
    %c0_31 = arith.constant 0 : index
    %63 = vector.load %arg11[%c0_30, %c0_31] : memref<16x128xf32, #tpu.memory_space<vmem>>, vector<16x128xf32>
    tpu.vector_store %arg11[%c0_30, %c0_31], %62 {strides = array<i32>} : memref<16x128xf32, #tpu.memory_space<vmem>>, vector<16x128xf32>,
    %c0_i32_32 = arith.constant 0 : i32
    %64 = arith.cmpi eq, %arg1, %c0_i32_32 : i32
    %65 = arith.extui %64 : i1 to i32
    %c0_i32_33 = arith.constant 0 : i32
    %66 = arith.cmpi ne, %65, %c0_i32_33 : i32
    scf.if %66 {
      %67 = tpu.concatenate %38, %26 in 1 : vector<16x32xf32>, vector<16x32xf32> -> vector<16x64xf32>
      %c0_34 = arith.constant 0 : index
      %c0_35 = arith.constant 0 : index
      %68 = vector.load %arg12[%c0_34, %c0_35] : memref<16x64xf32, #tpu.memory_space<vmem>>, vector<16x64xf32>
      tpu.vector_store %arg12[%c0_34, %c0_35], %67 {strides = array<i32>} : memref<16x64xf32, #tpu.memory_space<vmem>>, vector<16x64xf32>,
    } else {
    }
    return
  }
  func.func @transform_0(%arg0: i32, %arg1: i32) -> (i32, i32, i32) {
    %c0_i32 = arith.constant 0 : i32
    %c0_i32_0 = arith.constant 0 : i32
    return %arg1, %arg0, %c0_i32 : i32, i32, i32
  }
  func.func @transform_1(%arg0: i32, %arg1: i32) -> (i32, i32) {
    %c0_i32 = arith.constant 0 : i32
    %c0_i32_0 = arith.constant 0 : i32
    return %arg0, %c0_i32 : i32, i32
  }
  func.func @transform_2(%arg0: i32, %arg1: i32) -> (i32, i32) {
    %c0_i32 = arith.constant 0 : i32
    %c0_i32_0 = arith.constant 0 : i32
    return %arg0, %c0_i32 : i32, i32
  }
  func.func @transform_3(%arg0: i32, %arg1: i32) -> (i32, i32) {
    %c0_i32 = arith.constant 0 : i32
    %c0_i32_0 = arith.constant 0 : i32
    %c0_i32_1 = arith.constant 0 : i32
    return %c0_i32, %c0_i32_0 : i32, i32
  }
  func.func @transform_4(%arg0: i32, %arg1: i32) -> (i32, i32) {
    %c0_i32 = arith.constant 0 : i32
    %c0_i32_0 = arith.constant 0 : i32
    %c0_i32_1 = arith.constant 0 : i32
    return %c0_i32, %c0_i32_0 : i32, i32
  }
  func.func @transform_5(%arg0: i32, %arg1: i32) -> (i32, i32) {
    %c0_i32 = arith.constant 0 : i32
    %c0_i32_0 = arith.constant 0 : i32
    %c0_i32_1 = arith.constant 0 : i32
    return %c0_i32, %c0_i32_0 : i32, i32
  }
  func.func @transform_6(%arg0: i32, %arg1: i32) -> (i32, i32) {
    %c0_i32 = arith.constant 0 : i32
    %c0_i32_0 = arith.constant 0 : i32
    %c0_i32_1 = arith.constant 0 : i32
    return %c0_i32, %c0_i32_0 : i32, i32
  }
  func.func @transform_7(%arg0: i32, %arg1: i32) -> (i32, i32) {
    %c0_i32 = arith.constant 0 : i32
    %c0_i32_0 = arith.constant 0 : i32
    %c0_i32_1 = arith.constant 0 : i32
    return %c0_i32, %c0_i32_0 : i32, i32
  }
  func.func @transform_8(%arg0: i32, %arg1: i32) -> (i32, i32) {
    %c0_i32 = arith.constant 0 : i32
    %c0_i32_0 = arith.constant 0 : i32
    %c0_i32_1 = arith.constant 0 : i32
    return %c0_i32, %c0_i32_0 : i32, i32
  }
  func.func @transform_9(%arg0: i32, %arg1: i32) -> (i32, i32) {
    %c0_i32 = arith.constant 0 : i32
    %c0_i32_0 = arith.constant 0 : i32
    return %arg0, %c0_i32 : i32, i32
  }
  func.func @transform_10(%arg0: i32, %arg1: i32) -> (i32, i32) {
    %c0_i32 = arith.constant 0 : i32
    %c0_i32_0 = arith.constant 0 : i32
    return %arg0, %c0_i32 : i32, i32
  }
}

</mosaic_0001>

<bundles_post_ra>
// kernel: tpu_custom_call.1
= control target key start
LH: loop header
LB: loop body
LE: loop exit
PB: predicated region body
PF: predicated region fallthrough
CT: control target
= control target key end

     0   :  { %s1911_s0 = inlined_call_operand.vmem [shape: bf16[1,32,16], index: 0, kind: input, shape index: {}]   ;;  %s1912_s1 = inlined_call_operand.hbm [shape: f32[32,32], index: 1, kind: input, shape index: {}]   ;;  %s1913_s2 = inlined_call_operand.vmem [shape: f32[32,32], index: 2, kind: input, shape index: {}]   ;;  %s1914_s3 = inlined_call_operand.hbm [shape: bf16[16,128], index: 3, kind: input, shape index: {}]   ;;  %s1915_s4 = inlined_call_operand.hbm [shape: bf16[64,128], index: 4, kind: input, shape index: {}]   ;;  %s1916_s5 = inlined_call_operand.vmem [shape: f32[1,128], index: 5, kind: input, shape index: {}]   ;;  %s1917_s6 = inlined_call_operand.vmem [shape: f32[1,32], index: 6, kind: input, shape index: {}]   ;;  %s1918_s7 = inlined_call_operand.vmem [shape: f32[1,32], index: 7, kind: input, shape index: {}]   ;;  %s1919_s8 = inlined_call_operand.<no memory space> [shape: f32[1,1], index: 8, kind: input, shape index: {}]   ;;  %s1920_s9 = inlined_call_operand.hbm [shape: f32[32,128], index: 9, kind: output, shape index: {0}]   ;;  %s1921_s10 = inlined_call_operand.hbm [shape: f32[32,64], index: 10, kind: output, shape index: {1}]  }
   0x1   :  { %1931 = sst [smem:[#allocation20_spill]] %s1920_s9  ;;  %v16_v0 = vstv %s1919_s8 }
   0x2   :  { %1932 = sst [smem:[#allocation21_spill]] %s1921_s10  ;;  %17 = vst [vmem:[#allocation4] sm:$0x1] %v16_v0 }
   0x3   :  { %18 = vsyncpa [#allocation6], 0 }
   0x4   :  { %20 = vsyncpa [#allocation6 + $0x1], 0 }
   0x5   :  { %21 = vsyncpa [#allocation9], 0 }
   0x6   :  { %22 = vsyncpa [#allocation7], 0 }
   0x7   :  { %24 = vsyncpa [#allocation7 + $0x1], 0 }
   0x8   :  { %25 = vsyncpa [#allocation13], 0 }
   0x9   :  { %27 = vsyncpa [#allocation13 + $0x1], 0  ;;  %s1533_s15 = smov 0   ;;  %s1535_s16 = smov 0  }
   0xa   :  { %s1537_s17 = smov 0   ;;  %s1539_s18 = smov 0  }
   0xb   :  { %s1541_s19 = smov 0   ;;  %s1543_s20 = smov 0  }
   0xc LB: > { %1933 = sst [smem:[#allocation18_spill]] %s1436_s15  ;;  %s1043_s8 = sadd.s32 4294967295, %s1456_s20   ;;  %s1456_s20 = sphi %s1543_s20, %s33_s20   ;;  %s1452_s19 = sphi %s1541_s19, %s1958_s19   ;;  %s1448_s18 = sphi %s1539_s18, %s1957_s18   ;;  %s1444_s17 = sphi %s1537_s17, %s1956_s17   ;;  %s1440_s16 = sphi %s1535_s16, %s1955_s16   ;;  %s1436_s15 = sphi %s1533_s15, %s1954_s15  }
   0xd   : > { %s1044_s21 = sadd.s32 4294967294, %s1456_s20   ;;  %p93_p0 = scmp.ne.s32.totalorder %s1440_s16, %s1436_s15 }
   0xe   : > { %p1567_p1 = scmp.eq.s32.totalorder %s1043_s8, 0  ;;  %p1571_p2 = scmp.eq.s32.totalorder %s1043_s8, 1 }
   0xf   : > { %p275_p3 = scmp.eq.s32.totalorder %s1044_s21, 1  ;;  %p1045_p5 = scmp.ge.s32.totalorder %s1456_s20, 1 }
  0x10   : > { %s1934_s22 = scalar_select %p1567_p1, 1, 0 }
  0x11   : > { %p1577_p4 = por %p1567_p1, %p93_p0  ;;  %p1582_p6 = por %p275_p3, %p93_p0 }
  0x12   : > { %p308_p7 = scmp.lt.s32.totalorder %s1456_s20, 3  ;;  %s1458_s27 = smov [#allocation8]  }
  0x13   : > { %s1936_s24 = scalar_select %p1577_p4, 1, 0 }
  0x14   : > { %s1937_s25 = scalar_select %p1582_p6, 1, 0 }
  0x15   : > { %p1587_p8 = pnand %p1045_p5, %p308_p7  ;;  %s320_s28 = sshll.u32 %s1458_s27, 4  ;;  %s1591_s28 = int_to_ptr.vmem [resolvable:$true] %s320_s28 }
  0x16   : > { %1938 = sst [smem:[#allocation19_spill]] %s1937_s25  ;;  %s1459_s30 = smov [#allocation10]  }
  0x17   : > { %p1129_p9 = pneg %p1587_p8  ;;  %s333_s11 = sshll.u32 %s1459_s30, 4  ;;  %s1602_s11 = int_to_ptr.vmem [resolvable:$true] %s333_s11 }
  0x18   : > { %s1252_s14 = scalar_lea.hbm %s1914_s3, 128 }
  0x19   : > { %p1598_p11 = pnand %p1129_p9, %p1567_p1  ;;  %p1253_p12 = scmp.ne.s32.totalorder %s1914_s3, %s1252_s14 }
  0x1a   : > { %p1259_p5 = scmp.lt.u32.totalorder %s1252_s14, %s1914_s3 }
  0x1b   : > { %p1254_p13 = pneg %p1598_p11 }
  0x1d   : > { %p1255_p0 = pnand %p1254_p13, %p1253_p12 }
  0x1f   : > { %p1256_p3 = pneg %p1255_p0 }
  0x21   : > { %p1261_p7 = pnand %p1259_p5, %p1256_p3 }
  0x23   : > { %1264 = shalt.err (!%p1261_p7)
}
  0x24   : > { %s1265_s30 = scalar_lea.vmem %s1591_s28, 128  ;;  %p1273_p1 = scmp.lt.s32.totalorder %s1591_s28, %s1591_s28 }
  0x25   : > { %p1266_p9 = scmp.ne.s32.totalorder %s1591_s28, %s1265_s30  ;;  %p1274_p12 = scmp.lt.s32.totalorder %s1265_s30, %s1265_s30 }
  0x27   : > { %p1268_p10 = pnand %p1266_p9, %p1254_p13  ;;  %p1275_p0 = por %p1274_p12, %p1273_p1 }
  0x29   : > { %p1269_p6 = pneg %p1268_p10 }
  0x2b   : > { %p1276_p4 = pnand %p1275_p0, %p1269_p6 }
  0x2d   : > { %1279 = shalt.err (!%p1276_p4)
}
  0x2e   : > { %s1460_s25 = smov 64   ;;  %s1461_s12 = smov 4  }
  0x2f   : > { %1132 = dma.hbm_to_vmem [thread:$0]  (!%p1598_p11), %s1914_s3, 128, %s1591_s28, [#allocation9], %s1460_s25, %s1460_s25, %s1461_s12  }
  0x30   : > { %s1280_s27 = scalar_lea.hbm %s1915_s4, 512 }
  0x31   : > { %p1281_p1 = scmp.ne.s32.totalorder %s1915_s4, %s1280_s27  ;;  %p1287_p10 = scmp.lt.u32.totalorder %s1280_s27, %s1915_s4 }
  0x33   : > { %p1283_p4 = pnand %p1281_p1, %p1254_p13 }
  0x35   : > { %p1284_p6 = pneg %p1283_p4 }
  0x37   : > { %p1289_p3 = pnand %p1287_p10, %p1284_p6 }
  0x39   : > { %1292 = shalt.err (!%p1289_p3)
}
  0x3a   : > { %s1293_s28 = scalar_lea.vmem %s1602_s11, 512  ;;  %p1301_p12 = scmp.lt.s32.totalorder %s1602_s11, %s1602_s11 }
  0x3b   : > { %p1294_p5 = scmp.ne.s32.totalorder %s1602_s11, %s1293_s28  ;;  %p1302_p0 = scmp.lt.s32.totalorder %s1293_s28, %s1293_s28 }
  0x3d   : > { %p1296_p7 = pnand %p1294_p5, %p1254_p13  ;;  %p1303_p1 = por %p1302_p0, %p1301_p12 }
  0x3f   : > { %p1297_p9 = pneg %p1296_p7 }
  0x41   : > { %p1304_p4 = pnand %p1303_p1, %p1297_p9 }
  0x43   : > { %1307 = shalt.err (!%p1304_p4)
}
  0x44   : > { %1135 = dma.hbm_to_vmem [thread:$0]  (!%p1598_p11), %s1915_s4, 512, %s1602_s11, [#allocation9], %s1460_s25, %s1460_s25, %s1461_s12  }
  0x45   : > { %s45_s15 = sadd.s32 1, %s1452_s19  ;;  %s80_s13 = sadd.s32 1, %s1444_s17 }
  0x46   : > { %p47_p13 = scmp.ge.s32.totalorder %s45_s15, 2  ;;  %p87_p6 = scmp.ne.s32.totalorder %s1444_s17, %s1440_s16 }
  0x47   : > { %p88_p10 = scmp.eq.s32.totalorder %s1456_s20, 0  ;;  %p1149_p3 = scmp.lt.s32.totalorder %s1456_s20, 2 }
  0x48   : > { %s1960_s15 = smov (%p47_p13, %s45_s15), 0  ;;  %p1666_p7 = por %p1571_p2, %p87_p6 }
  0x49   : > { %p89_p5 = por %p88_p10, %p87_p6  ;;  %s77_s14 = ssub.s32 %s1452_s19, %s1960_s15 }
  0x4a   : > { %s1941_s29 = scalar_select %p1666_p7, 1, 0 }
  0x4b   : > { %s372_s8 = sand.u32 1, %s1444_s17   ;;  %p78_p9 = scmp.eq.s32.totalorder %s77_s14, 0 }
  0x4c   : > { %s1049_s11 = sshll.u32 %s372_s8, 4  ;;  %s1087_s25 = sshll.u32 %s1452_s19, 8 }
  0x4d   : > { %s1675_s12 = scalar_select %p78_p9, %s1444_s17, %s80_s13  }
  0x4e   : > { %s1680_s30 = scalar_lea.hbm %s1912_s1, %s1087_s25  ;;  %s376_s23 = scalar_lea.vmem [#allocation5], %s1049_s11 }
  0x4f   : > { %s383_s28 = sshll.u32 %s376_s23, 4  ;;  %p1684_p2 = pnand %p1149_p3, %p89_p5  ;;  %s1688_s28 = int_to_ptr.vmem [resolvable:$true] %s383_s28 }
  0x50   : > { %s1690_s10 = scalar_lea.sflag [#allocation6], %s372_s8  ;;  %s1308_s13 = scalar_lea.hbm %s1680_s30, 256 }
  0x51   : > { %p1309_p11 = scmp.ne.s32.totalorder %s1680_s30, %s1308_s13  ;;  %p1310_p12 = pneg %p1684_p2 }
  0x52   : > { %s1313_s25 = scalar_lea.hbm %s1912_s1, 512  ;;  %p1314_p4 = scmp.lt.u32.totalorder %s1680_s30, %s1912_s1 }
  0x53   : > { %p1311_p0 = pnand %p1310_p12, %p1309_p11  ;;  %p1315_p13 = scmp.lt.u32.totalorder %s1313_s25, %s1308_s13 }
  0x54   : > { %p1317_p10 = scmp.lt.u32.totalorder %s1308_s13, %s1680_s30 }
  0x55   : > { %p1312_p1 = pneg %p1311_p0  ;;  %p1316_p6 = por %p1315_p13, %p1314_p4 }
  0x57   : > { %p1318_p3 = por %p1317_p10, %p1316_p6 }
  0x59   : > { %p1319_p5 = pnand %p1318_p3, %p1312_p1 }
  0x5b   : > { %1322 = shalt.err (!%p1319_p5)
}
  0x5c   : > { %s1323_s8 = scalar_lea.vmem %s1688_s28, 256  ;;  %s1462_s23 = smov [#allocation5]  }
  0x5d   : > { %p1324_p9 = scmp.ne.s32.totalorder %s1688_s28, %s1323_s8  ;;  %s1328_s14 = sshll.u32 %s1462_s23, 4  ;;  %s1329_s14 = int_to_ptr.vmem [resolvable:$false] %s1328_s14 }
  0x5e   : > { %s1330_s11 = scalar_lea.vmem %s1329_s14, 512  ;;  %p1331_p7 = scmp.lt.s32.totalorder %s1688_s28, %s1329_s14 }
  0x5f   : > { %p1326_p11 = pnand %p1324_p9, %p1310_p12  ;;  %p1332_p4 = scmp.lt.s32.totalorder %s1330_s11, %s1323_s8 }
  0x61   : > { %p1327_p0 = pneg %p1326_p11  ;;  %p1333_p13 = por %p1332_p4, %p1331_p7 }
  0x63   : > { %p1334_p6 = pnand %p1333_p13, %p1327_p0 }
  0x65   : > { %1337 = shalt.err (!%p1334_p6)
}
  0x66   : > { %s1463_s13 = smov 128   ;;  %s1464_s25 = smov 8  }
  0x67   : > { %1139 = dma.hbm_to_vmem [thread:$0]  (!%p1684_p2), %s1680_s30, 256, %s1688_s28, %s1690_s10, %s1463_s13, %s1463_s13, %s1464_s25  }
  0x68   : > { %404 = sbr.rel (%p1587_p8) target bundleno = 1413 (0x585), region = 56  ;;  %s1721_s21 = sand.u32 (!%p1587_p8), 1, %s1440_s16  }
  0x69   : > { %s1724_s27 = sshll.u32 (!%p1587_p8), %s1721_s21, 4  ;;  %s407_s8 = scalar_lea.sflag (!%p1587_p8), [#allocation6], %s1721_s21 }
  0x6a   : > { %s410_s23 = scalar_lea.vmem (!%p1587_p8), [#allocation5], %s1724_s27  ;;  %p1943_p7 = scmp.ne.s32.totalorder (!%p1587_p8), %s1936_s24, 0 }
  0x6f   : > { %1419 = dma.done.wait (%p1943_p7), %s407_s8, 256  }
  0x70   : > { %1421 = vsyncadd (%p1943_p7), %s407_s8, 4294967040  ;;  %p1944_p2 = scmp.ne.s32.totalorder %s1934_s22, 0 }
  0x72   : > { %1423 = dma.done.wait (%p1944_p2), [#allocation9], 640  }
  0x73   : > { %1425 = vsyncadd (%p1944_p2), [#allocation9], 4294966656  ;;  %s1058_s26 = sshll.u32 %s1448_s18, 1  ;;  %v1465_v1 = vmov 0.0   ;;  %vm1466_vm0 = vmmov 0   ;;  %vm500_vm1 = vcmask 261120  }
  0x74   : > { %p477_p8 = scmp.lt.s32.totalorder %s1058_s26, 3  ;;  %1097 = vmatprep.subr.bf16.mxu0 %v1465_v1  ;;  %1109 = vmatprep.subr.bf16.mxu1 %v1465_v1  ;;  %v1222_v5 = vld [vmem:[#allocation10] sm:$0xff]   ;;  %s1467_s10 = smov 32   ;;  %v1223_v6 = vld [vmem:[#allocation10 + $0x8] sm:$0xff]   ;;  %v1225_v7 = vld [vmem:[#allocation8] sm:$0xff]   ;;  %vm615_vm2 = vcmask 130048  }
  0x75   : > { %1111 = vmatprep.mubr.msk.bf16.mxu1 %vm1466_vm0, %v1465_v1  ;;  %1105 = vmatprep.mubr.msk.bf16.mxu0 %vm1466_vm0, %v1465_v1  ;;  %v1224_v8 = vld [vmem:[#allocation10 + $0x10] sm:$0xff]   ;;  %v1226_v10 = vld [vmem:[#allocation10 + $0x18] sm:$0xff]   ;;  %vm518_vm3 = vcmask 523264   ;;  %s466_s14 = scalar_lea.vmem [#allocation11], %s1724_s27  ;;  %s1945_s8 = sld [smem:[#allocation20_spill]] }
  0x76   : > { %s1962_s26 = smov (!%p477_p8, %s1058_s26), 3  ;;  %1098 = vmatpush3.bf16.msra.mxu0 %v1222_v5  ;;  %1110 = vmatpush3.bf16.msra.mxu1 %v1225_v7  ;;  %v503_v12 = vld [vmem:[%s410_s23] sm:$0xff]  ;;  %v504_v13 = vld [vmem:[%s410_s23 + $0x8] sm:$0xff]  ;;  %s1468_s23 = smov 64  }
  0x77   : > { %s1061_s24 = sshll.u32 %s1962_s26, 3  ;;  %s1059_s9 = sshll.u32 %s1962_s26, 2  ;;  %1099 = vmatprep.subr.bf16.mxu0 %v1465_v1  ;;  %v1070_v25 = vld [vmem:[%s1916_s5] ss:$0 sm:$0xff] }
  0x78   : > { %s489_s22 = scalar_lea.vmem %s1913_s2, %s1061_s24  ;;  %s482_s13 = scalar_lea.vmem %s1911_s0, %s1059_s9  ;;  %v1073_v57 = vld [vmem:[%s1917_s6] ss:$0 sm:$0xff] }
  0x79   : > { %v505_v2 = vld [vmem:[%s489_s22] sm:$0xff]  ;;  %v506_v3 = vld [vmem:[%s489_s22 + $0x8] sm:$0xff]  ;;  %s1469_s26 = smov 96   ;;  %s1930_s9 = sshll.u32 %s1448_s18, 8 }
  0x7a   : > { %v1215_v4 = vpack.i.bf16 %v506_v3, %v505_v2  ;;  %501 = vst.msk [vmem:[#allocation2] sm:$0xff] %vm500_vm1, %v505_v2  ;;  %502 = vst.msk [vmem:[#allocation2 + $0x8] sm:$0xff] %vm500_vm1, %v506_v3  ;;  %1100 = vmatpush3.bf16.msra.mxu0 %v1223_v6  ;;  %v1227_v9 = vld [vmem:[%s482_s13] sm:$0xff]   ;;  %s865_s11 = sshll.u32 %s466_s14, 4  ;;  %s847_s24 = scalar_lea.sflag [#allocation7], %s1721_s21  ;;  %s1804_s11 = int_to_ptr.vmem [resolvable:$true] %s865_s11 }
  0x7b   : > { %1101 = vmatprep.subr.bf16.mxu0 %v1465_v1  ;;  %1112 = vmatmul.mubr.msk.bf16.vlgmr.msra.gmra.mrb[0].mxu1 %vm615_vm2, %v1227_v9  ;;  %v1076_v63 = vld [vmem:[%s1918_s7] ss:$0 sm:$0xff]  ;;  %s1338_s30 = scalar_lea.vmem %s1804_s11, 256  ;;  %p1946_p1 = scmp.ne.s32.totalorder %s1941_s29, 0 }
  0x7c   : > { %1216 = vrot.lane.b32.xlu0 %v1215_v4, %s1467_s10  ;;  %p1339_p12 = scmp.ne.s32.totalorder %s1804_s11, %s1338_s30 }
  0x7e   : > { %1102 = vmatpush3.bf16.msra.mxu0 %v1224_v8  ;;  %p1340_p10 = pnand %p1339_p12, %p1946_p1 }
  0x7f   : > { %1103 = vmatprep.subr.bf16.mxu0 %v1465_v1 }
  0x80   : > { %p1341_p3 = pneg %p1340_p10 }
  0x81   : > { %v684_v34 = vld [vmem:[#allocation2 + $0x8] sm:$0xff]  ;;  %v683_v36 = vld [vmem:[#allocation2] sm:$0xff] }
  0x82   : > { %1104 = vmatpush3.bf16.msra.mxu0 %v1226_v10 }
  0xee   : > { %v1217_v11 = vpop.permute.xlu0 %1216 }
  0xef   : > { %v1219_v14 = vunpack.i.h.bf16 %v1217_v11  ;;  %v1218_v15 = vunpack.i.l.bf16 %v1217_v11 }
  0xf1   : > { %v515_v16 = vsel %vm500_vm1, %v503_v12, %v1218_v15  ;;  %v516_v17 = vsel %vm500_vm1, %v504_v13, %v1219_v14 }
  0xf2   : > { %v517_v18 = vpack.c.bf16 %v516_v17, %v515_v16 }
  0xf4   : > { %519 = vst.msk [vmem:[#allocation3] sm:$0xff] %vm518_vm3, %v517_v18 }
  0xfb   : > { %v526_v19 = vld [vmem:[#allocation3] sm:$0xff] }
  0xfc   : > { %1106 = vmatmul.mubr.msk.bf16.vlgmr.msra.gmra.mrb[0].mxu0 %vm518_vm3, %v526_v19 }
 0x14e   : > { %v653_v20 = vpop.f32.mrb[0].mxu1 }
 0x14f   : > { %v1113_v21 = vpop.f32.mrb[1].mxu1 }
 0x150   : > { %v656_v22 = vpop.f32.mrb[2].mxu1 }
 0x151   : > { %v1114_v23 = vpop.f32.mrb[3].mxu1 }
 0x1cf   : > { %v597_v24 = vpop.f32.mrb[0].mxu0 }
 0x1d0   : > { %v654_v26 = vadd.f32 %v653_v20, %v597_v24  ;;  %v1107_v27 = vpop.f32.mrb[1].mxu0 }
 0x1d1   : > { %v600_v28 = vpop.f32.mrb[2].mxu0  ;;  %v1470_v27 = vmov 0  }
 0x1d2   : > { %v667_v29 = vadd.f32 %v1070_v25, %v654_v26  ;;  %v657_v30 = vadd.f32 %v656_v22, %v600_v28  ;;  %v1108_v31 = vpop.f32.mrb[3].mxu0  ;;  %1220 = vset.pattern.permute.xlu0 %v1470_v27  ;;  %1221 = vset.pattern.permute.xlu1 %v1470_v27  ;;  %v1077_v28 = vld [vmem:[#allocation4] ss:$0 sm:$0xff] }
 0x1d4   : > { %1228 = vtanh.f32 %v667_v29  ;;  %v668_v32 = vadd.f32 %v1070_v25, %v657_v30  ;;  %v1071_v37 = vmul.f32 -1.442695, %v667_v29 }
 0x1d6   : > { %1230 = vtanh.f32 %v668_v32  ;;  %v1072_v38 = vmul.f32 -1.442695, %v668_v32 }
 0x1d7   : > { %1232 = vpow2.f32 %v1071_v37 }
 0x1d8   : > { %1234 = vpow2.f32 %v1072_v38 }
 0x1de   : > { %v1229_v33 = vpop.eup %1228 }
 0x1df   : > { %697 = vrot.lane.b32.xlu0 %v1229_v33, %s1468_s23  ;;  %v817_v33 = vlaneseq }
 0x1e0   : > { %v1231_v35 = vpop.eup %1230 }
 0x1e1   : > { %699 = vrot.lane.b32.xlu1 %v1231_v35, %s1468_s23  ;;  %v1233_v39 = vpop.eup %1232 }
 0x1e2   : > { %v1235_v40 = vpop.eup %1234  ;;  %v675_v41 = vadd.f32 1.0, %v1233_v39 }
 0x1e3   : > { %689 = vrot.lane.b32.xlu0 %v684_v34, %s1467_s10  ;;  %v676_v42 = vadd.f32 1.0, %v1235_v40  ;;  %v818_v34 = vand.u32 127, %v817_v33 }
 0x1e4   : > { %1236 = vrcp.f32 %v675_v41 }
 0x1e5   : > { %687 = vrot.lane.b32.xlu1 %v683_v36, %s1467_s10  ;;  %1238 = vrcp.f32 %v676_v42  ;;  %vm820_vm4 = vcmp.eq.s32.totalorder %v818_v34, 0 }
 0x1e6   : > { %v1078_v35 = vsel %vm820_vm4, 1.0, %v1465_v1 }
 0x1ee   : > { %v1237_v43 = vpop.eup %1236 }
 0x1ef   : > { %v1239_v46 = vpop.eup %1238 }
 0x251   : > { %v698_v44 = vpop.permute.xlu0 %697 }
 0x252   : > { %v703_v45 = vmul.f32 %v1237_v43, %v698_v44 }
 0x253   : > { %v700_v47 = vpop.permute.xlu1 %699 }
 0x254   : > { %707 = vrot.lane.b32.xlu1 %v703_v45, %s1467_s10  ;;  %v704_v48 = vmul.f32 %v1239_v46, %v700_v47 }
 0x255   : > { %v690_v50 = vpop.permute.xlu0 %689 }
 0x256   : > { %709 = vrot.lane.b32.xlu0 %v704_v48, %s1467_s10  ;;  %v694_v54 = vmul.f32 %v1239_v46, %v690_v50 }
 0x257   : > { %v688_v49 = vpop.permute.xlu1 %687 }
 0x258   : > { %v693_v51 = vmul.f32 %v1237_v43, %v688_v49 }
 0x2c6   : > { %v708_v52 = vpop.permute.xlu1 %707 }
 0x2c7   : > { %v1770_v53 = vadd.f32 %v708_v52, %v693_v51 }
 0x2c8   : > { %v710_v55 = vpop.permute.xlu0 %709 }
 0x2c9   : > { %724 = vrot.lane.b32.xlu1 %v1770_v53, %s1469_s26  ;;  %v1773_v56 = vadd.f32 %v710_v55, %v694_v54  ;;  %1240 = vtanh.f32 %v1770_v53 }
 0x2cb   : > { %726 = vrot.lane.b32.xlu0 %v1773_v56, %s1469_s26  ;;  %1242 = vtanh.f32 %v1773_v56 }
 0x2d3   : > { %v1241_v62 = vpop.eup %1240 }
 0x2d5   : > { %v1243_v0 = vpop.eup %1242 }
 0x33b   : > { %v725_v58 = vpop.permute.xlu1 %724 }
 0x33c   : > { %v730_v59 = vmul.f32 %v1073_v57, %v725_v58  ;;  %767 = vst.msk [vmem:[#allocation2] sm:$0xff] %vm500_vm1, %v725_v58 }
 0x33d   : > { %v727_v60 = vpop.permute.xlu0 %726 }
 0x33e   : > { %734 = vrot.lane.b32.xlu1 %v730_v59, %s1469_s26  ;;  %v731_v61 = vmul.f32 %v1073_v57, %v727_v60  ;;  %768 = vst.msk [vmem:[#allocation2 + $0x8] sm:$0xff] %vm500_vm1, %v727_v60 }
 0x340   : > { %736 = vrot.lane.b32.xlu0 %v731_v61, %s1469_s26 }
 0x342   : > { %758 = vrot.lane.b32.xlu1 %v1241_v62, %s1468_s23 }
 0x344   : > { %760 = vrot.lane.b32.xlu0 %v1243_v0, %s1468_s23  ;;  %s1807_s23 = scalar_lea.vmem [#allocation12], %s1724_s27  ;;  %s1471_s27 = smov [#allocation11]  }
 0x345   : > { %s1342_s28 = sshll.u32 %s1471_s27, 4  ;;  %s1343_s28 = int_to_ptr.vmem [resolvable:$false] %s1342_s28 }
 0x346   : > { %789 = vrot.lane.b32.xlu1 %v1076_v63, %s1469_s26  ;;  %s881_s26 = sshll.u32 %s1807_s23, 4  ;;  %s1344_s22 = scalar_lea.vmem %s1343_s28, 512  ;;  %s1846_s26 = int_to_ptr.vmem [resolvable:$true] %s881_s26 }
 0x347   : > { %p1345_p5 = scmp.lt.s32.totalorder %s1804_s11, %s1343_s28  ;;  %p1346_p9 = scmp.lt.s32.totalorder %s1344_s22, %s1338_s30 }
 0x349   : > { %p1347_p11 = por %p1346_p9, %p1345_p5 }
 0x34b   : > { %p1348_p0 = pnand %p1347_p11, %p1341_p3 }
 0x3b0   : > { %v735_v2 = vpop.permute.xlu1 %734 }
 0x3b1   : > { %v740_v3 = vadd.f32 %v735_v2, %v667_v29 }
 0x3b2   : > { %v737_v5 = vpop.permute.xlu0 %736 }
 0x3b3   : > { %v1074_v4 = vmul.f32 -1.442695, %v740_v3  ;;  %v741_v6 = vadd.f32 %v737_v5, %v668_v32 }
 0x3b4   : > { %v759_v12 = vpop.permute.xlu1 %758 }
 0x3b5   : > { %1244 = vpow2.f32 %v1074_v4  ;;  %v1075_v7 = vmul.f32 -1.442695, %v741_v6 }
 0x3b6   : > { %v761_v18 = vpop.permute.xlu0 %760 }
 0x3b7   : > { %1246 = vpow2.f32 %v1075_v7 }
 0x3b8   : > { %v790_v15 = vpop.permute.xlu1 %789 }
 0x3bf   : > { %v1245_v8 = vpop.eup %1244 }
 0x3c0   : > { %v748_v9 = vadd.f32 1.0, %v1245_v8 }
 0x3c1   : > { %v1247_v10 = vpop.eup %1246 }
 0x3c2   : > { %1248 = vrcp.f32 %v748_v9  ;;  %v749_v11 = vadd.f32 1.0, %v1247_v10 }
 0x3c4   : > { %1250 = vrcp.f32 %v749_v11 }
 0x3cc   : > { %v1249_v13 = vpop.eup %1248 }
 0x3cd   : > { %v764_v14 = vmul.f32 %v1249_v13, %v759_v12 }
 0x3ce   : > { %v1251_v16 = vpop.eup %1250 }
 0x3cf   : > { %v781_v17 = vmax.f32 %v764_v14, 0.0  ;;  %v765_v19 = vmul.f32 %v1251_v16, %v761_v18 }
 0x3d1   : > { %v792_v20 = vmul.f32 %v790_v15, %v781_v17  ;;  %v782_v21 = vmax.f32 %v765_v19, 0.0 }
 0x3d3   : > { %796 = vrot.lane.b32.xlu0 %v792_v20, %s1467_s10  ;;  %v793_v22 = vmul.f32 %v790_v15, %v782_v21 }
 0x3d5   : > { %798 = vrot.lane.b32.xlu1 %v793_v22, %s1467_s10 }
 0x445   : > { %v797_v23 = vpop.permute.xlu0 %796 }
 0x446   : > { %v802_v24 = vsel %vm500_vm1, %v797_v23, 0.0 }
 0x447   : > { %803 = vadd.xlane.f32.xlu0 %v802_v24  ;;  %v799_v25 = vpop.permute.xlu1 %798 }
 0x448   : > { %v805_v26 = vsel %vm500_vm1, %v799_v25, 0.0 }
 0x449   : > { %806 = vadd.xlane.f32.xlu1 %v805_v26 }
 0x4d4   : > { %v804_v29 = vpop.xlane.xlu0 %803 }
 0x4d5   : > { %v815_v30 = vadd.f32 %v1077_v28, %v804_v29 }
 0x4d6   : > { %v807_v31 = vpop.xlane.xlu1 %806 }
 0x4d7   : > { %827 = vperm.xlu0 %1220, %v815_v30   ;;  %v816_v32 = vadd.f32 %v1077_v28, %v807_v31 }
 0x4d9   : > { %832 = vperm.xlu1 %1221, %v816_v32  }
 0x4dd   : > { %771 = vrot.lane.b32.xlu1 %v764_v14, %s1467_s10 }
 0x4e1   : > { %773 = vrot.lane.b32.xlu1 %v765_v19, %s1467_s10  ;;  %s1802_s10 = scalar_lea.hbm %s1945_s8, %s1930_s9 }
 0x556   : > { %v828_v36 = vpop.permute.xlu0 %827 }
 0x557   : > { %v835_v37 = vmul.f32 %v1078_v35, %v828_v36 }
 0x558   : > { %v833_v38 = vpop.permute.xlu1 %832 }
 0x559   : > { %v836_v39 = vmul.f32 %v1078_v35, %v833_v38  ;;  %839 = vst [vmem:[%s466_s14] sm:$0xff] %v835_v37 }
 0x55b   : > { %840 = vst [vmem:[%s466_s14 + $0x8] sm:$0xff] %v836_v39 }
 0x55c   : > { %v772_v1 = vpop.permute.xlu1 %771 }
 0x55d   : > { %v1812_v40 = vsel %vm500_vm1, %v772_v1, %v1770_v53 }
 0x55e   : > { %844 = vst.msk [vmem:[%s1807_s23] sm:$0xff] %vm518_vm3, %v1812_v40 }
 0x55f   : > { %1351 = shalt.err (!%p1348_p0)
}
 0x560   : > { %s1352_s14 = scalar_lea.hbm %s1802_s10, 256  ;;  %s1356_s27 = scalar_lea.hbm %s1945_s8, 512 }
 0x561   : > { %p1353_p4 = scmp.ne.s32.totalorder %s1802_s10, %s1352_s14  ;;  %p1357_p7 = scmp.lt.u32.totalorder %s1802_s10, %s1945_s8 }
 0x562   : > { %p1358_p2 = scmp.lt.u32.totalorder %s1356_s27, %s1352_s14  ;;  %p1360_p12 = scmp.lt.u32.totalorder %s1352_s14, %s1802_s10 }
 0x563   : > { %p1354_p13 = pnand %p1353_p4, %p1946_p1 }
 0x564   : > { %p1359_p8 = por %p1358_p2, %p1357_p7 }
 0x565   : > { %p1355_p6 = pneg %p1354_p13 }
 0x566   : > { %p1361_p10 = por %p1360_p12, %p1359_p8 }
 0x568   : > { %p1362_p3 = pnand %p1361_p10, %p1355_p6 }
 0x56a   : > { %1365 = shalt.err (!%p1362_p3)
}
 0x56b   : > { %s1472_s30 = smov 128   ;;  %s1473_s22 = smov 8   ;;  %v774_v41 = vpop.permute.xlu1 %773 }
 0x56c   : > { %1125 = dma.vmem_to_hbm [thread:$0]  (%p1946_p1), %s1804_s11, 256, %s1802_s10, %s847_s24, %s1472_s30, %s1472_s30, %s1473_s22   ;;  %v778_v42 = vsel %vm500_vm1, %v774_v41, %v1773_v56 }
 0x56d   : > { %s1947_s9 = sshll.u32 %s1448_s18, 8  ;;  %s1948_s25 = sld [smem:[#allocation21_spill]]  ;;  %v779_v43 = vpack.c.bf16 %v778_v42, %v1812_v40  ;;  %845 = vst.msk [vmem:[%s1807_s23 + $0x8] sm:$0xff] %vm518_vm3, %v778_v42 }
 0x56e   : > { %s852_s11 = scalar_lea.sflag [#allocation13], %s1721_s21  ;;  %s1366_s10 = scalar_lea.vmem %s1846_s26, 256 }
 0x56f   : > { %p1367_p5 = scmp.ne.s32.totalorder %s1846_s26, %s1366_s10  ;;  %s1474_s24 = smov [#allocation12]  }
 0x570   : > { %s1370_s18 = sshll.u32 %s1474_s24, 4  ;;  %s1371_s18 = int_to_ptr.vmem [resolvable:$false] %s1370_s18 }
 0x571   : > { %p1368_p9 = pnand %p1367_p5, %p1946_p1  ;;  %s1372_s28 = scalar_lea.vmem %s1371_s18, 512 }
 0x572   : > { %p1373_p0 = scmp.lt.s32.totalorder %s1846_s26, %s1371_s18  ;;  %p1374_p4 = scmp.lt.s32.totalorder %s1372_s28, %s1366_s10 }
 0x573   : > { %s1853_s27 = scalar_lea.hbm %s1948_s25, %s1947_s9  ;;  %p1369_p11 = pneg %p1368_p9 }
 0x574   : > { %p1375_p13 = por %p1374_p4, %p1373_p0 }
 0x576   : > { %p1376_p6 = pnand %p1375_p13, %p1369_p11 }
 0x578   : > { %1379 = shalt.err (!%p1376_p6)
}
 0x579   : > { %s1380_s23 = scalar_lea.hbm %s1853_s27, 256  ;;  %s1384_s13 = scalar_lea.hbm %s1948_s25, 512 }
 0x57a   : > { %p1381_p7 = scmp.ne.s32.totalorder %s1853_s27, %s1380_s23  ;;  %p1385_p12 = scmp.lt.u32.totalorder %s1853_s27, %s1948_s25 }
 0x57b   : > { %p1386_p10 = scmp.lt.u32.totalorder %s1384_s13, %s1380_s23  ;;  %p1388_p5 = scmp.lt.u32.totalorder %s1380_s23, %s1853_s27 }
 0x57c   : > { %p1382_p2 = pnand %p1381_p7, %p1946_p1 }
 0x57d   : > { %p1387_p3 = por %p1386_p10, %p1385_p12 }
 0x57e   : > { %p1383_p8 = pneg %p1382_p2 }
 0x57f   : > { %p1389_p9 = por %p1388_p5, %p1387_p3 }
 0x581   : > { %p1390_p11 = pnand %p1389_p9, %p1383_p8 }
 0x583   : > { %1393 = shalt.err (!%p1390_p11)
}
 0x584   : > { %1126 = dma.vmem_to_hbm [thread:$0]  (%p1946_p1), %s1846_s26, 256, %s1853_s27, %s852_s11, %s1472_s30, %s1472_s30, %s1473_s22   ;;  %780 = vst.msk [vmem:[#allocation3] sm:$0xff] %vm518_vm3, %v779_v43 }
 0x585 PF: > { %s1949_s10 = sld [smem:[#allocation18_spill]]  ;;  %s1950_s28 = sld [smem:[#allocation19_spill]] }
 0x586   : > { %p1952_p4 = scmp.ge.s32.totalorder %s1456_s20, 2 }
 0x58b   : > { %s896_s23 = sand.u32 1, %s1949_s10   ;;  %p1951_p0 = scmp.ne.s32.totalorder %s1950_s28, 0 }
 0x58c   : > { %s897_s9 = scalar_lea.sflag [#allocation7], %s896_s23 }
 0x58d   : > { %p1141_p13 = pnand %p1952_p4, %p1951_p0 }
 0x58f   : > { %1427 = dma.done.wait (!%p1141_p13), %s897_s9, 256  }
 0x590   : > { %1429 = vsyncadd (!%p1141_p13), %s897_s9, 4294967040  ;;  %s906_s29 = scalar_lea.sflag [#allocation13], %s896_s23 }
 0x591   : > { %1431 = dma.done.wait (!%p1141_p13), %s906_s29, 256  }
 0x592   : > { %1433 = vsyncadd (!%p1141_p13), %s906_s29, 4294967040  ;;  %s33_s20 = sadd.s32 1, %s1456_s20   ;;  %s1953_s21 = smov %s1960_s15 }
 0x593   : > { %p30_p6 = scmp.ge.s32.totalorder %s33_s20, 4   ;;  %s1954_s15 = smov %s1440_s16 }
 0x594   : > { %s1955_s16 = smov %s1444_s17  ;;  %s1956_s17 = smov %s1675_s12 }
 0x595   : > { %s1957_s18 = smov %s1452_s19  ;;  %s1958_s19 = smov %s1953_s21 }
 0x596   :  { %32 = sbr.rel (!%p30_p6) target bundleno = 12 (0xc), region = 140 }
 0x59d   :  { %911 = vsyncpa [#allocation6], 1 }
 0x59e   :  { %913 = vsyncpa [#allocation6 + $0x1], 1 }
 0x59f   :  { %914 = vsyncpa [#allocation9], 1 }
 0x5a0   :  { %915 = vsyncpa [#allocation7], 1 }
 0x5a1   :  { %917 = vsyncpa [#allocation7 + $0x1], 1 }
 0x5a2   :  { %918 = vsyncpa [#allocation13], 1 }
 0x5a3   :  { %920 = vsyncpa [#allocation13 + $0x1], 1 }

</bundles_post_ra>
